<compile_context>
chip_gen: v7x
topology: tpu7x:2x2x1
jax: 0.10.0
libtpu: 0.0.40
codegen_flags: <defaults>
</compile_context>

<pallas_src>
import numpy as np
import jax
import jax.numpy as jnp
from jax.experimental import pallas as pl
from jax.experimental.pallas import tpu as pltpu


def make_acrnn_pallas(T, C, n_classes, Ft, Fs, kt, pool, stride, block_b=64):
    """Builds the fused-param preparation fn and the Pallas forward fn."""
    attn_dim = max(C // 4, 1)
    pad = kt // 2
    Tpad = T + 2 * pad                   # time extent the kernel sees (pre-padded)
    T1 = Tpad - kt + 1                   # valid temporal-conv output length
    n_pool = (T - pool) // stride + 1    # == module's n_features (classifier kernel)
    assert (n_pool - 1) * stride + pool <= T1
    O = Ft * Fs                          # feature channels after grouped conv
    nc = n_classes
    K = kt * C                           # im2col contraction size

    def fuse_params(raw_params):
        """Fold conv1+BN1+grouped conv2+BN2 (eval mode) into one matmul weight/bias,
        flatten the classifier weight, and build the constant pooling matrix."""
        (wa1, ba1, wa2, ba2, w1, bn1_scale, bn1_shift,
         w2, bn2_scale, bn2_shift, wc, bc) = raw_params
        f_of_o = jnp.arange(O) // Fs                       # group id per output channel
        s1o = bn1_scale[f_of_o]                            # (O,)
        sh1o = bn1_shift[f_of_o]                           # (O,)
        s2o = bn2_scale.reshape(O)
        sh2o = bn2_shift.reshape(O)
        w1o = w1[f_of_o, :]                                # (O, kt)
        # wf[k*C + c, o] = w1[f(o), k] * bn1_scale[f(o)] * w2[o, c] * bn2_scale[o]
        wf = w1o[:, :, None] * (w2 * (s1o * s2o)[:, None])[:, None, :]   # (O, kt, C)
        wf = jnp.transpose(wf, (1, 2, 0)).reshape(K, O)
        bf = (s2o * sh1o * jnp.sum(w2, axis=1) + sh2o).reshape(1, O)
        wcf = wc.reshape(n_pool * O, nc)                   # classifier, (p,o)-major
        pm = np.zeros((n_pool, Tpad), np.float32)          # pooling matrix (p, t)
        for p in range(n_pool):
            pm[p, p * stride:p * stride + pool] = 1.0 / pool
        pmat = jnp.asarray(pm)
        return (wa1, ba1, wa2, ba2, wf, bf, pmat, wcf, bc)

    def forward(x, fused_params):
        (wa1, ba1, wa2, ba2, wf, bf, pmat, wcf, bc) = fused_params
        B = x.shape[0]
        Bb = block_b if B >= block_b else B
        Bpad = pl.cdiv(B, Bb) * Bb
        G = Bpad // Bb
        # Wrapper-side layout plumbing only: pad batch + time, unfold time (im2col).
        xp = jnp.pad(x, ((0, Bpad - B), (pad, pad + kt), (0, 0)))
        x_unf = jnp.concatenate([xp[:, k:k + Tpad, :] for k in range(kt)], axis=-1)
        inv_T = 1.0 / T

        def kernel(x_ref, wa1_ref, ba1_ref, wa2_ref, ba2_ref,
                   wf_ref, bf_ref, pm_ref, wc_ref, bc_ref, o_ref):
            xs = x_ref[...]                                        # (Bb, Tpad, K)

            # ---- channel attention: mean(time) -> Linear -> tanh -> Linear -> softmax
            pooled = jnp.sum(xs[:, :, :C], axis=1) * inv_T         # (Bb, C)
            h = jnp.tanh(jnp.dot(pooled, wa1_ref[...],
                                 preferred_element_type=jnp.float32) + ba1_ref[...])
            al = jnp.dot(h, wa2_ref[...],
                         preferred_element_type=jnp.float32) + ba2_ref[...]
            al = al - jnp.max(al, axis=1, keepdims=True)
            e = jnp.exp(al)
            attn = e * pl.reciprocal(jnp.sum(e, axis=1, keepdims=True), approx=True)
            attn_t = jnp.concatenate([attn] * kt, axis=-1)         # (Bb, K)
            xw = xs * attn_t[:, None, :]                           # (Bb, Tpad, K)

            # ---- conv1 + BN1 + grouped conv2 + BN2 fused into a single matmul
            out2 = jnp.dot(xw.reshape(Bb * Tpad, K), wf_ref[...],
                           preferred_element_type=jnp.float32) + bf_ref[...]
            out2 = out2 * out2                                     # square
            out3 = out2.reshape(Bb, Tpad, O)

            # ---- average pool over time as one batched matmul vs pooling matrix
            pmb = jnp.broadcast_to(pm_ref[...][None], (Bb, n_pool, Tpad))
            feat = jnp.einsum('bpt,bto->bpo', pmb, out3,
                              preferred_element_type=jnp.float32)  # (Bb, n_pool, O)
            feat = jnp.log(jnp.maximum(feat, 1e-6))                # safe_log
            # TODO(synk): nn.Dropout is treated as eval-mode identity.

            # ---- classifier: flatten (p, o) onto lanes, single matmul, log-softmax
            featf = jnp.concatenate([feat[:, p, :] for p in range(n_pool)], axis=-1)
            logits = jnp.dot(featf, wc_ref[...],
                             preferred_element_type=jnp.float32) + bc_ref[...]
            z = logits - jnp.max(logits, axis=1, keepdims=True)
            lse = jnp.log(jnp.sum(jnp.exp(z), axis=1, keepdims=True))
            o_ref[0] = z - lse                                     # (Bb, nc)

        grid_spec = pltpu.PrefetchScalarGridSpec(
            num_scalar_prefetch=0,
            grid=(G,),
            in_specs=[
                pl.BlockSpec((Bb, Tpad, K), lambda b: (b, 0, 0)),   # unfolded input
                pl.BlockSpec((C, attn_dim), lambda b: (0, 0)),      # attn linear 1 W
                pl.BlockSpec((1, attn_dim), lambda b: (0, 0)),      # attn linear 1 b
                pl.BlockSpec((attn_dim, C), lambda b: (0, 0)),      # attn linear 2 W
                pl.BlockSpec((1, C), lambda b: (0, 0)),             # attn linear 2 b
                pl.BlockSpec((K, O), lambda b: (0, 0)),             # fused conv weight
                pl.BlockSpec((1, O), lambda b: (0, 0)),             # fused conv bias
                pl.BlockSpec((n_pool, Tpad), lambda b: (0, 0)),     # pooling matrix
                pl.BlockSpec((n_pool * O, nc), lambda b: (0, 0)),   # classifier weight
                pl.BlockSpec((1, nc), lambda b: (0, 0)),            # classifier bias
            ],
            out_specs=pl.BlockSpec((1, Bb, nc), lambda b: (b, 0, 0)),
        )
        out = pl.pallas_call(
            kernel,
            out_shape=jax.ShapeDtypeStruct((G, Bb, nc), jnp.float32),
            grid_spec=grid_spec,
            compiler_params=pltpu.CompilerParams(
                dimension_semantics=("parallel",)),
        )(x_unf, wa1, ba1, wa2, ba2, wf, bf, pmat, wcf, bc)
        return out.reshape(Bpad, nc)[:B]

    dims = dict(attn_dim=attn_dim, pad=pad, Tpad=Tpad, T1=T1, n_pool=n_pool, O=O)
    return forward, fuse_params, dims


if __name__ == "__main__":
    # Small but forward-consistent hyper-parameters.
    B = 4
    T, C = 64, 8               # n_timepoints, n_channels
    n_classes = 4
    Ft, Fs = 8, 4              # n_filters_t, n_filters_s
    kt = 8                     # filter_size_t  (filter_size_s = n_channels)
    pool, stride = 16, 8       # pool_size_1, pool_stride_1

    forward, fuse_params, dims = make_acrnn_pallas(
        T, C, n_classes, Ft, Fs, kt, pool, stride, block_b=2)   # grid of 2 blocks
    attn_dim, pad, T1, n_pool, O = (dims["attn_dim"], dims["pad"], dims["T1"],
                                    dims["n_pool"], dims["O"])
    assert n_pool == (T - pool) // stride + 1   # matches module's n_features

    key = jax.random.PRNGKey(0)
    ks = jax.random.split(key, 16)
    f32 = jnp.float32

    x = jax.random.normal(ks[0], (B, T, C), f32)

    # channel attention Linear weights (stored transposed: (in, out))
    wa1 = 0.3 * jax.random.normal(ks[1], (C, attn_dim), f32)
    ba1 = 0.1 * jax.random.normal(ks[2], (1, attn_dim), f32)
    wa2 = 0.3 * jax.random.normal(ks[3], (attn_dim, C), f32)
    ba2 = 0.1 * jax.random.normal(ks[4], (1, C), f32)

    # temporal conv weight (Ft, 1, kt, 1) -> (Ft, kt)
    w1 = 0.2 * jax.random.normal(ks[5], (Ft, kt), f32)

    # BatchNorm2d(Ft), eval mode, fused to scale/shift
    g1 = 1.0 + 0.1 * jax.random.normal(ks[6], (Ft,), f32)
    b1 = 0.1 * jax.random.normal(ks[7], (Ft,), f32)
    m1 = 0.1 * jax.random.normal(ks[8], (Ft,), f32)
    v1 = 0.9 + 0.2 * jax.random.uniform(ks[9], (Ft,), dtype=f32)
    bn1_scale = g1 / jnp.sqrt(v1 + 1e-5)
    bn1_shift = b1 - m1 * bn1_scale

    # grouped spatial conv weight (Ft*Fs, 1, 1, C) -> (O, C)
    w2 = 0.2 * jax.random.normal(ks[10], (O, C), f32)

    # BatchNorm2d(Ft*Fs), eval mode
    g2 = 1.0 + 0.1 * jax.random.normal(ks[11], (O,), f32)
    b2 = 0.1 * jax.random.normal(ks[12], (O,), f32)
    m2 = 0.1 * jax.random.normal(ks[13], (O,), f32)
    v2 = 0.9 + 0.2 * jax.random.uniform(ks[14], (O,), dtype=f32)
    s2 = g2 / jnp.sqrt(v2 + 1e-5)
    bn2_scale = s2.reshape(1, O)
    bn2_shift = (b2 - m2 * s2).reshape(1, O)

    # classifier Conv2dNormWeight (nc, O, n_features, 1), max_norm=0.5 renorm on dim 0
    kk = jax.random.split(ks[15], 2)
    wc_t = 0.2 * jax.random.normal(kk[0], (n_classes, O, n_pool), f32)
    norms = jnp.sqrt(jnp.sum(wc_t ** 2, axis=(1, 2), keepdims=True))
    wc_t = wc_t * jnp.minimum(1.0, 0.5 / jnp.maximum(norms, 1e-12))
    wc = jnp.transpose(wc_t, (2, 1, 0))        # kernel layout (n_pool, O, nc)
    bc = 0.1 * jax.random.normal(kk[1], (1, n_classes), f32)

    raw_params = (wa1, ba1, wa2, ba2, w1, bn1_scale, bn1_shift,
                  w2, bn2_scale, bn2_shift, wc, bc)
    fused_params = jax.tree_util.tree_map(jax.block_until_ready,
                                          fuse_params(raw_params))

    out = jax.block_until_ready(forward(x, fused_params))
    assert out.shape == (B, n_classes)

    # plain-JAX reference (unfused, mirrors the PyTorch module) for sanity checking
    def reference(x):
        pooled = jnp.mean(x, axis=1)                                    # (B, C)
        h = jnp.tanh(pooled @ wa1 + ba1)
        a = jax.nn.softmax(h @ wa2 + ba2, axis=1)
        xw = x * a[:, None, :]
        xpad = jnp.pad(xw, ((0, 0), (pad, pad), (0, 0)))
        out1 = jnp.zeros((B, Ft, T1, C), f32)
        for k in range(kt):
            out1 = out1 + w1[None, :, k, None, None] * xpad[:, None, k:k + T1, :]
        out1 = out1 * bn1_scale[None, :, None, None] + bn1_shift[None, :, None, None]
        out1r = jnp.repeat(out1, Fs, axis=1)                            # (B, O, T1, C)
        o2 = jnp.einsum('botc,oc->bot', out1r, w2, precision='highest')
        o2 = o2 * bn2_scale.reshape(1, O, 1) + bn2_shift.reshape(1, O, 1)
        o2 = o2 ** 2
        feat = jnp.stack([o2[:, :, p * stride:p * stride + pool].mean(-1)
                          for p in range(n_pool)], axis=-1)             # (B, O, n_pool)
        feat = jnp.log(jnp.maximum(feat, 1e-6))
        logits = jnp.einsum('bop,cop->bc', feat, wc_t, precision='highest') + bc
        return jax.nn.log_softmax(logits, axis=1)

    ref = reference(x)
    np.testing.assert_allclose(np.asarray(out), np.asarray(ref), rtol=5e-2, atol=5e-2)
    print("KERNEL_OK")
</pallas_src>

<mosaic_0001>
module attributes {stable_mosaic.version = 11 : i64} {
  func.func @kernel(%arg0: i32, %arg1: memref<2x72x64xf32, #tpu.memory_space<vmem>>, %arg2: memref<8x2xf32, #tpu.memory_space<vmem>>, %arg3: memref<1x2xf32, #tpu.memory_space<vmem>>, %arg4: memref<2x8xf32, #tpu.memory_space<vmem>>, %arg5: memref<1x8xf32, #tpu.memory_space<vmem>>, %arg6: memref<64x32xf32, #tpu.memory_space<vmem>>, %arg7: memref<1x32xf32, #tpu.memory_space<vmem>>, %arg8: memref<7x72xf32, #tpu.memory_space<vmem>>, %arg9: memref<224x4xf32, #tpu.memory_space<vmem>>, %arg10: memref<1x4xf32, #tpu.memory_space<vmem>>, %arg11: memref<1x2x4xf32, #tpu.memory_space<vmem>>) attributes {dimension_semantics = [#tpu.dimension_semantics<parallel>], iteration_bounds = array<i64: 2>, scalar_prefetch = 0 : i64, scratch_operands = 0 : i64, tpu.core_type = #tpu.core_type<tc>, window_params = [{transform_indices = @transform_0, window_bounds = array<i64: 2, 72, 64>}, {pipeline_mode = #tpu.pipeline_mode<synchronous>, transform_indices = @transform_1, window_bounds = array<i64: 8, 2>}, {pipeline_mode = #tpu.pipeline_mode<synchronous>, transform_indices = @transform_2, window_bounds = array<i64: 1, 2>}, {pipeline_mode = #tpu.pipeline_mode<synchronous>, transform_indices = @transform_3, window_bounds = array<i64: 2, 8>}, {pipeline_mode = #tpu.pipeline_mode<synchronous>, transform_indices = @transform_4, window_bounds = array<i64: 1, 8>}, {pipeline_mode = #tpu.pipeline_mode<synchronous>, transform_indices = @transform_5, window_bounds = array<i64: 64, 32>}, {pipeline_mode = #tpu.pipeline_mode<synchronous>, transform_indices = @transform_6, window_bounds = array<i64: 1, 32>}, {pipeline_mode = #tpu.pipeline_mode<synchronous>, transform_indices = @transform_7, window_bounds = array<i64: 7, 72>}, {pipeline_mode = #tpu.pipeline_mode<synchronous>, transform_indices = @transform_8, window_bounds = array<i64: 224, 4>}, {pipeline_mode = #tpu.pipeline_mode<synchronous>, transform_indices = @transform_9, window_bounds = array<i64: 1, 4>}, {transform_indices = @transform_10, window_bounds = array<i64: 1, 2, 4>}]} {
    %c0 = arith.constant 0 : index
    %c0_0 = arith.constant 0 : index
    %c0_1 = arith.constant 0 : index
    %0 = vector.load %arg1[%c0, %c0_0, %c0_1] : memref<2x72x64xf32, #tpu.memory_space<vmem>>, vector<2x72x64xf32>
    %1 = vector.extract_strided_slice %0 {offsets = [0, 0, 0], sizes = [2, 72, 8], strides = [1, 1, 1]} : vector<2x72x64xf32> to vector<2x72x8xf32>
    %cst = arith.constant dense<0.000000e+00> : vector<2x8xf32>
    %2 = vector.multi_reduction <add>, %1, %cst [1] : vector<2x72x8xf32> to vector<2x8xf32>
    %cst_2 = arith.constant 1.562500e-02 : f32
    %3 = vector.broadcast %cst_2 : f32 to vector<2x8xf32>
    %4 = arith.mulf %2, %3 : vector<2x8xf32>
    %c0_3 = arith.constant 0 : index
    %c0_4 = arith.constant 0 : index
    %5 = vector.load %arg2[%c0_3, %c0_4] : memref<8x2xf32, #tpu.memory_space<vmem>>, vector<8x2xf32>
    %cst_5 = arith.constant dense<0.000000e+00> : vector<2x2xf32>
    %6 = tpu.matmul %4, %5, %cst_5 {dimension_numbers = #tpu.dot_dimension_numbers<[1], [0], [0], [1], [0, 0, 1, 1], [], []>} : vector<2x8xf32>, vector<8x2xf32>, vector<2x2xf32> -> vector<2x2xf32>
    %c0_6 = arith.constant 0 : index
    %c0_7 = arith.constant 0 : index
    %7 = vector.load %arg3[%c0_6, %c0_7] : memref<1x2xf32, #tpu.memory_space<vmem>>, vector<1x2xf32>
    %8 = vector.broadcast %7 : vector<1x2xf32> to vector<2x2xf32>
    %9 = arith.addf %6, %8 : vector<2x2xf32>
    %10 = math.tanh %9 : vector<2x2xf32>
    %c0_8 = arith.constant 0 : index
    %c0_9 = arith.constant 0 : index
    %11 = vector.load %arg4[%c0_8, %c0_9] : memref<2x8xf32, #tpu.memory_space<vmem>>, vector<2x8xf32>
    %cst_10 = arith.constant dense<0.000000e+00> : vector<2x8xf32>
    %12 = tpu.matmul %10, %11, %cst_10 {dimension_numbers = #tpu.dot_dimension_numbers<[1], [0], [0], [1], [0, 0, 1, 1], [], []>} : vector<2x2xf32>, vector<2x8xf32>, vector<2x8xf32> -> vector<2x8xf32>
    %c0_11 = arith.constant 0 : index
    %c0_12 = arith.constant 0 : index
    %13 = vector.load %arg5[%c0_11, %c0_12] : memref<1x8xf32, #tpu.memory_space<vmem>>, vector<1x8xf32>
    %14 = vector.broadcast %13 : vector<1x8xf32> to vector<2x8xf32>
    %15 = arith.addf %12, %14 : vector<2x8xf32>
    %cst_13 = arith.constant dense<0xFF800000> : vector<2xf32>
    %16 = vector.multi_reduction <maximumf>, %15, %cst_13 [1] : vector<2x8xf32> to vector<2xf32>
    %17 = vector.shape_cast %16 : vector<2xf32> to vector<2x1xf32>
    %18 = vector.broadcast %17 : vector<2x1xf32> to vector<2x8xf32>
    %19 = arith.subf %15, %18 : vector<2x8xf32>
    %20 = math.exp %19 : vector<2x8xf32>
    %cst_14 = arith.constant dense<0.000000e+00> : vector<2xf32>
    %21 = vector.multi_reduction <add>, %20, %cst_14 [1] : vector<2x8xf32> to vector<2xf32>
    %22 = vector.shape_cast %21 : vector<2xf32> to vector<2x1xf32>
    %23 = tpu.reciprocal %22 {approx = true} : vector<2x1xf32> -> vector<2x1xf32>
    %24 = vector.broadcast %23 : vector<2x1xf32> to vector<2x8xf32>
    %25 = arith.mulf %20, %24 : vector<2x8xf32>
    %26 = tpu.concatenate %25, %25, %25, %25, %25, %25, %25, %25 in 1 : vector<2x8xf32>, vector<2x8xf32>, vector<2x8xf32>, vector<2x8xf32>, vector<2x8xf32>, vector<2x8xf32>, vector<2x8xf32>, vector<2x8xf32> -> vector<2x64xf32>
    %27 = vector.shape_cast %26 : vector<2x64xf32> to vector<2x1x64xf32>
    %28 = vector.broadcast %27 : vector<2x1x64xf32> to vector<2x72x64xf32>
    %29 = arith.mulf %0, %28 : vector<2x72x64xf32>
    %30 = vector.shape_cast %29 : vector<2x72x64xf32> to vector<144x64xf32>
    %c0_15 = arith.constant 0 : index
    %c0_16 = arith.constant 0 : index
    %31 = vector.load %arg6[%c0_15, %c0_16] : memref<64x32xf32, #tpu.memory_space<vmem>>, vector<64x32xf32>
    %cst_17 = arith.constant dense<0.000000e+00> : vector<144x32xf32>
    %32 = tpu.matmul %30, %31, %cst_17 {dimension_numbers = #tpu.dot_dimension_numbers<[1], [0], [0], [1], [0, 0, 1, 1], [], []>} : vector<144x64xf32>, vector<64x32xf32>, vector<144x32xf32> -> vector<144x32xf32>
    %c0_18 = arith.constant 0 : index
    %c0_19 = arith.constant 0 : index
    %33 = vector.load %arg7[%c0_18, %c0_19] : memref<1x32xf32, #tpu.memory_space<vmem>>, vector<1x32xf32>
    %34 = vector.broadcast %33 : vector<1x32xf32> to vector<144x32xf32>
    %35 = arith.addf %32, %34 : vector<144x32xf32>
    %36 = arith.mulf %35, %35 : vector<144x32xf32>
    %37 = vector.shape_cast %36 : vector<144x32xf32> to vector<2x72x32xf32>
    %c0_20 = arith.constant 0 : index
    %c0_21 = arith.constant 0 : index
    %38 = vector.load %arg8[%c0_20, %c0_21] : memref<7x72xf32, #tpu.memory_space<vmem>>, vector<7x72xf32>
    %39 = vector.shape_cast %38 : vector<7x72xf32> to vector<1x7x72xf32>
    %40 = vector.shape_cast %39 : vector<1x7x72xf32> to vector<1x7x72xf32>
    %41 = vector.broadcast %40 : vector<1x7x72xf32> to vector<2x7x72xf32>
    "tpu.trace_start"() <{level = 10 : i32, message = "bpt,bto->bpo"}> : () -> ()
    %cst_22 = arith.constant dense<0.000000e+00> : vector<2x7x32xf32>
    %42 = tpu.matmul %41, %37, %cst_22 {dimension_numbers = #tpu.dot_dimension_numbers<[2], [1], [1], [2], [0, 0, 0, 1, 1, 2], [0], [0]>} : vector<2x7x72xf32>, vector<2x72x32xf32>, vector<2x7x32xf32> -> vector<2x7x32xf32>
    "tpu.trace_stop"() : () -> ()
    %cst_23 = arith.constant 9.99999997E-7 : f32
    %43 = vector.broadcast %cst_23 : f32 to vector<2x7x32xf32>
    %44 = arith.maximumf %42, %43 : vector<2x7x32xf32>
    %45 = math.log %44 : vector<2x7x32xf32>
    %46 = vector.extract_strided_slice %45 {offsets = [0, 0, 0], sizes = [2, 1, 32], strides = [1, 1, 1]} : vector<2x7x32xf32> to vector<2x1x32xf32>
    %47 = vector.shape_cast %46 : vector<2x1x32xf32> to vector<2x32xf32>
    %48 = vector.extract_strided_slice %45 {offsets = [0, 1, 0], sizes = [2, 1, 32], strides = [1, 1, 1]} : vector<2x7x32xf32> to vector<2x1x32xf32>
    %49 = vector.shape_cast %48 : vector<2x1x32xf32> to vector<2x32xf32>
    %50 = vector.extract_strided_slice %45 {offsets = [0, 2, 0], sizes = [2, 1, 32], strides = [1, 1, 1]} : vector<2x7x32xf32> to vector<2x1x32xf32>
    %51 = vector.shape_cast %50 : vector<2x1x32xf32> to vector<2x32xf32>
    %52 = vector.extract_strided_slice %45 {offsets = [0, 3, 0], sizes = [2, 1, 32], strides = [1, 1, 1]} : vector<2x7x32xf32> to vector<2x1x32xf32>
    %53 = vector.shape_cast %52 : vector<2x1x32xf32> to vector<2x32xf32>
    %54 = vector.extract_strided_slice %45 {offsets = [0, 4, 0], sizes = [2, 1, 32], strides = [1, 1, 1]} : vector<2x7x32xf32> to vector<2x1x32xf32>
    %55 = vector.shape_cast %54 : vector<2x1x32xf32> to vector<2x32xf32>
    %56 = vector.extract_strided_slice %45 {offsets = [0, 5, 0], sizes = [2, 1, 32], strides = [1, 1, 1]} : vector<2x7x32xf32> to vector<2x1x32xf32>
    %57 = vector.shape_cast %56 : vector<2x1x32xf32> to vector<2x32xf32>
    %58 = vector.extract_strided_slice %45 {offsets = [0, 6, 0], sizes = [2, 1, 32], strides = [1, 1, 1]} : vector<2x7x32xf32> to vector<2x1x32xf32>
    %59 = vector.shape_cast %58 : vector<2x1x32xf32> to vector<2x32xf32>
    %60 = tpu.concatenate %47, %49, %51, %53, %55, %57, %59 in 1 : vector<2x32xf32>, vector<2x32xf32>, vector<2x32xf32>, vector<2x32xf32>, vector<2x32xf32>, vector<2x32xf32>, vector<2x32xf32> -> vector<2x224xf32>
    %c0_24 = arith.constant 0 : index
    %c0_25 = arith.constant 0 : index
    %61 = vector.load %arg9[%c0_24, %c0_25] : memref<224x4xf32, #tpu.memory_space<vmem>>, vector<224x4xf32>
    %cst_26 = arith.constant dense<0.000000e+00> : vector<2x4xf32>
    %62 = tpu.matmul %60, %61, %cst_26 {dimension_numbers = #tpu.dot_dimension_numbers<[1], [0], [0], [1], [0, 0, 1, 1], [], []>} : vector<2x224xf32>, vector<224x4xf32>, vector<2x4xf32> -> vector<2x4xf32>
    %c0_27 = arith.constant 0 : index
    %c0_28 = arith.constant 0 : index
    %63 = vector.load %arg10[%c0_27, %c0_28] : memref<1x4xf32, #tpu.memory_space<vmem>>, vector<1x4xf32>
    %64 = vector.broadcast %63 : vector<1x4xf32> to vector<2x4xf32>
    %65 = arith.addf %62, %64 : vector<2x4xf32>
    %cst_29 = arith.constant dense<0xFF800000> : vector<2xf32>
    %66 = vector.multi_reduction <maximumf>, %65, %cst_29 [1] : vector<2x4xf32> to vector<2xf32>
    %67 = vector.shape_cast %66 : vector<2xf32> to vector<2x1xf32>
    %68 = vector.broadcast %67 : vector<2x1xf32> to vector<2x4xf32>
    %69 = arith.subf %65, %68 : vector<2x4xf32>
    %70 = math.exp %69 : vector<2x4xf32>
    %cst_30 = arith.constant dense<0.000000e+00> : vector<2xf32>
    %71 = vector.multi_reduction <add>, %70, %cst_30 [1] : vector<2x4xf32> to vector<2xf32>
    %72 = vector.shape_cast %71 : vector<2xf32> to vector<2x1xf32>
    %73 = math.log %72 : vector<2x1xf32>
    %74 = vector.broadcast %73 : vector<2x1xf32> to vector<2x4xf32>
    %75 = arith.subf %69, %74 : vector<2x4xf32>
    %c0_31 = arith.constant 0 : index
    %c0_32 = arith.constant 0 : index
    %c0_33 = arith.constant 0 : index
    %76 = vector.load %arg11[%c0_31, %c0_32, %c0_33] : memref<1x2x4xf32, #tpu.memory_space<vmem>>, vector<1x2x4xf32>
    %77 = vector.shape_cast %76 : vector<1x2x4xf32> to vector<2x4xf32>
    %78 = vector.shape_cast %75 : vector<2x4xf32> to vector<1x2x4xf32>
    tpu.vector_store %arg11[%c0_31, %c0_32, %c0_33], %78 {strides = array<i32>} : memref<1x2x4xf32, #tpu.memory_space<vmem>>, vector<1x2x4xf32>,
    return
  }
  func.func @transform_0(%arg0: i32) -> (i32, i32, i32) {
    %c0_i32 = arith.constant 0 : i32
    %c0_i32_0 = arith.constant 0 : i32
    %c0_i32_1 = arith.constant 0 : i32
    return %arg0, %c0_i32, %c0_i32_0 : i32, i32, i32
  }
  func.func @transform_1(%arg0: i32) -> (i32, i32) {
    %c0_i32 = arith.constant 0 : i32
    %c0_i32_0 = arith.constant 0 : i32
    %c0_i32_1 = arith.constant 0 : i32
    return %c0_i32, %c0_i32_0 : i32, i32
  }
  func.func @transform_2(%arg0: i32) -> (i32, i32) {
    %c0_i32 = arith.constant 0 : i32
    %c0_i32_0 = arith.constant 0 : i32
    %c0_i32_1 = arith.constant 0 : i32
    return %c0_i32, %c0_i32_0 : i32, i32
  }
  func.func @transform_3(%arg0: i32) -> (i32, i32) {
    %c0_i32 = arith.constant 0 : i32
    %c0_i32_0 = arith.constant 0 : i32
    %c0_i32_1 = arith.constant 0 : i32
    return %c0_i32, %c0_i32_0 : i32, i32
  }
  func.func @transform_4(%arg0: i32) -> (i32, i32) {
    %c0_i32 = arith.constant 0 : i32
    %c0_i32_0 = arith.constant 0 : i32
    %c0_i32_1 = arith.constant 0 : i32
    return %c0_i32, %c0_i32_0 : i32, i32
  }
  func.func @transform_5(%arg0: i32) -> (i32, i32) {
    %c0_i32 = arith.constant 0 : i32
    %c0_i32_0 = arith.constant 0 : i32
    %c0_i32_1 = arith.constant 0 : i32
    return %c0_i32, %c0_i32_0 : i32, i32
  }
  func.func @transform_6(%arg0: i32) -> (i32, i32) {
    %c0_i32 = arith.constant 0 : i32
    %c0_i32_0 = arith.constant 0 : i32
    %c0_i32_1 = arith.constant 0 : i32
    return %c0_i32, %c0_i32_0 : i32, i32
  }
  func.func @transform_7(%arg0: i32) -> (i32, i32) {
    %c0_i32 = arith.constant 0 : i32
    %c0_i32_0 = arith.constant 0 : i32
    %c0_i32_1 = arith.constant 0 : i32
    return %c0_i32, %c0_i32_0 : i32, i32
  }
  func.func @transform_8(%arg0: i32) -> (i32, i32) {
    %c0_i32 = arith.constant 0 : i32
    %c0_i32_0 = arith.constant 0 : i32
    %c0_i32_1 = arith.constant 0 : i32
    return %c0_i32, %c0_i32_0 : i32, i32
  }
  func.func @transform_9(%arg0: i32) -> (i32, i32) {
    %c0_i32 = arith.constant 0 : i32
    %c0_i32_0 = arith.constant 0 : i32
    %c0_i32_1 = arith.constant 0 : i32
    return %c0_i32, %c0_i32_0 : i32, i32
  }
  func.func @transform_10(%arg0: i32) -> (i32, i32, i32) {
    %c0_i32 = arith.constant 0 : i32
    %c0_i32_0 = arith.constant 0 : i32
    %c0_i32_1 = arith.constant 0 : i32
    return %arg0, %c0_i32, %c0_i32_0 : i32, i32, i32
  }
}

</mosaic_0001>

<bundles_post_ra>
// kernel: tpu_custom_call.1
= control target key start
LH: loop header
LB: loop body
LE: loop exit
PB: predicated region body
PF: predicated region fallthrough
CT: control target
= control target key end

     0   :  { %15 = vsyncpa [#allocation3], 0  ;;  %s2231_s0 = inlined_call_operand.vmem [shape: f32[4,72,64], index: 0, kind: input, shape index: {}]   ;;  %s2232_s1 = inlined_call_operand.vmem [shape: f32[8,2], index: 1, kind: input, shape index: {}]   ;;  %s2233_s2 = inlined_call_operand.vmem [shape: f32[1,2], index: 2, kind: input, shape index: {}]   ;;  %s2234_s3 = inlined_call_operand.vmem [shape: f32[2,8], index: 3, kind: input, shape index: {}]   ;;  %s2235_s4 = inlined_call_operand.vmem [shape: f32[1,8], index: 4, kind: input, shape index: {}]   ;;  %s2236_s5 = inlined_call_operand.vmem [shape: f32[64,32], index: 5, kind: input, shape index: {}]   ;;  %s2237_s6 = inlined_call_operand.vmem [shape: f32[1,32], index: 6, kind: input, shape index: {}]   ;;  %s2238_s7 = inlined_call_operand.vmem [shape: f32[7,72], index: 7, kind: input, shape index: {}]   ;;  %s2239_s8 = inlined_call_operand.vmem [shape: f32[224,4], index: 8, kind: input, shape index: {}]   ;;  %s2240_s9 = inlined_call_operand.vmem [shape: f32[1,4], index: 9, kind: input, shape index: {}]   ;;  %s2241_s10 = inlined_call_operand.hbm [shape: f32[2,2,4], index: 10, kind: output, shape index: {}]  }
   0x1   :  { %17 = vsyncpa [#allocation3 + $0x1], 0  ;;  %s1798_s13 = smov 0   ;;  %s1800_s14 = smov 0  }
   0x2   :  { %s1802_s15 = smov 0   ;;  %s1804_s16 = smov 0  }
   0x3 LB: > { %s1819_s17 = sadd.s32 4294967295, %s1727_s16   ;;  %s1332_s18 = sadd.s32 4294967294, %s1727_s16   ;;  %s1727_s16 = sphi %s1804_s16, %s2247_s16   ;;  %s1723_s15 = sphi %s1802_s15, %s2246_s15   ;;  %s1719_s14 = sphi %s1800_s14, %s2245_s14   ;;  %s1715_s13 = sphi %s1798_s13, %s2244_s13  }
   0x4   : > { %s1823_s19 = sadd.s32 1, %s1727_s16   ;;  %s245_s20 = sadd.s32 1, %s1723_s15 }
   0x5   : > { %s242_s21 = ssub.s32 %s1727_s16, %s1823_s19  ;;  %p255_p0 = scmp.ne.s32.totalorder %s1723_s15, %s1719_s14 }
   0x6   : > { %p243_p1 = scmp.eq.s32.totalorder %s242_s21, 0  ;;  %p256_p2 = scmp.eq.s32.totalorder %s1819_s17, 1 }
   0x7   : > { %p261_p3 = scmp.ne.s32.totalorder %s1719_s14, %s1715_s13  ;;  %p262_p4 = scmp.eq.s32.totalorder %s1332_s18, 1 }
   0x8   : > { %s1834_s22 = scalar_select %p243_p1, %s1723_s15, %s245_s20  }
   0x9   : > { %p1836_p5 = por %p256_p2, %p255_p0  ;;  %p1840_p6 = por %p262_p4, %p261_p3 }
   0xa   : > { %p1335_p7 = scmp.ge.s32.totalorder %s1727_s16, 1  ;;  %p317_p8 = scmp.lt.s32.totalorder %s1727_s16, 3 }
   0xc   : > { %p318_p9 = pnand %p1335_p7, %p317_p8 }
   0xd   : > { %v430_v0 = vld [vmem:[%s2232_s1] sm:$0xff] (!%p318_p9)  ;;  %s1337_s27 = sshll.u32 (!%p318_p9), %s1819_s17, 1  ;;  %v1729_v1 = vmov (!%p318_p9), 0.0   ;;  %vm1730_vm0 = vmmov (!%p318_p9), 0   ;;  %vm381_vm1 = vcmask (!%p318_p9), 64512   ;;  %vm440_vm2 = vcmask (!%p318_p9), 1041409  }
   0xe   : > { %321 = sbr.rel (%p318_p9) target bundleno = 2111 (0x83f), region = 60  ;;  %1421 = vmatprep.subr.mxu1 (!%p318_p9), %v1729_v1  ;;  %1423 = vmatprep.mubr.msk.f32.mxu1 (!%p318_p9), %vm1730_vm0, %v1729_v1  ;;  %p357_p10 = scmp.lt.s32.totalorder (!%p318_p9), %s1337_s27, 3  ;;  %vm527_vm3 = vcmask (!%p318_p9), 1041408   ;;  %vm523_vm4 = vcmask (!%p318_p9), 15360   ;;  %vm601_vm5 = vcmask (!%p318_p9), 58368   ;;  %vm636_vm6 = vcmask (!%p318_p9), 130048  }
   0xf   : > { %1422 = vmatpush3.msra.mxu1 (!%p318_p9), %v430_v0  ;;  %s1732_s12 = smov (!%p318_p9), 8   ;;  %s1733_s26 = smov (!%p318_p9), 16   ;;  %vm638_vm7 = vcmask (!%p318_p9), 195584   ;;  %vm640_vm8 = vcmask (!%p318_p9), 261120   ;;  %vm642_vm9 = vcmask (!%p318_p9), 326656   ;;  %vm644_vm10 = vcmask (!%p318_p9), 392192  }
  0x10   : > { %1426 = vmatprep.subr.mxu1 (!%p318_p9), %v1729_v1  ;;  %s1735_s25 = smov (!%p318_p9), 40   ;;  %vm646_vm11 = vcmask (!%p318_p9), 457728   ;;  %vm714_vm12 = vcmask (!%p318_p9), 523264   ;;  %vm943_vm13 = vcmask (!%p318_p9), 588800   ;;  %s1741_s29 = smov (!%p318_p9), 96   ;;  %vm1133_vm14 = vcmask (!%p318_p9), 785408  }
  0x11   : > { %vm1245_vm15 = vcmask (!%p318_p9), 25600   ;;  %s1368_s20 = sshll.u32 (!%p318_p9), %s1819_s17, 5  ;;  %s1742_s17 = smov (!%p318_p9), [#allocation2]  }
  0x12   : > { %s1669_s30 = sshll.u32 (!%p318_p9), %s1742_s17, 4  ;;  %s1670_s30 = int_to_ptr.vmem [resolvable:$false] %s1669_s30 }
  0x15   : > { %s2249_s27 = smov (!%p357_p10, %s1337_s27), 3 }
  0x16   : > { %s1598_s28 = smul.u32 72, %s2249_s27  ;;  %s1737_s27 = smov 56  }
  0x18   : > { %s1857_s11 = scalar_lea.vmem %s2231_s0, %s1598_s28  ;;  %s1740_s28 = smov 64  }
  0x19   : > { %v1860_v2 = vld [vmem:[%s1857_s11] sm:$0xff]  ;;  %v1863_v3 = vld [vmem:[%s1857_s11 + $0x8] sm:$0xff]  ;;  %v1866_v4 = vld [vmem:[%s1857_s11 + $0x10] sm:$0xff] }
  0x1a   : > { %v1869_v5 = vld [vmem:[%s1857_s11 + $0x18] sm:$0xff]  ;;  %v382_v6 = vsel %vm381_vm1, %v1860_v2, 0.0  ;;  %v383_v7 = vsel %vm381_vm1, %v1863_v3, 0.0  ;;  %v385_v8 = vsel %vm381_vm1, %v1866_v4, 0.0  ;;  %v1878_v9 = vld [vmem:[%s1857_s11 + $0x20] sm:$0xff]  ;;  %v1881_v11 = vld [vmem:[%s1857_s11 + $0x48] sm:$0xff] }
  0x1b   : > { %v384_v10 = vadd.f32 %v383_v7, %v382_v6  ;;  %v1884_v12 = vld [vmem:[%s1857_s11 + $0x50] sm:$0xff]  ;;  %v1887_v13 = vld [vmem:[%s1857_s11 + $0x58] sm:$0xff]  ;;  %v387_v14 = vsel %vm381_vm1, %v1869_v5, 0.0  ;;  %v1892_v15 = vld [vmem:[%s1857_s11 + $0x28] sm:$0xff]  ;;  %v405_v18 = vsel %vm381_vm1, %v1881_v11, 0.0  ;;  %v389_v22 = vsel %vm381_vm1, %v1878_v9, 0.0 }
  0x1c   : > { %v1895_v16 = vld [vmem:[%s1857_s11 + $0x60] sm:$0xff]  ;;  %v406_v19 = vsel %vm381_vm1, %v1884_v12, 0.0  ;;  %v408_v20 = vsel %vm381_vm1, %v1887_v13, 0.0  ;;  %v1904_v21 = vld [vmem:[%s1857_s11 + $0x68] sm:$0xff]  ;;  %v1909_v24 = vld [vmem:[%s1857_s11 + $0x30] sm:$0xff]  ;;  %v391_v28 = vsel %vm381_vm1, %v1892_v15, 0.0 }
  0x1d   : > { %v386_v17 = vadd.f32 %v385_v8, %v384_v10  ;;  %v407_v23 = vadd.f32 %v406_v19, %v405_v18  ;;  %v410_v26 = vsel %vm381_vm1, %v1895_v16, 0.0  ;;  %v1914_v27 = vld [vmem:[%s1857_s11 + $0x70] sm:$0xff]  ;;  %v1919_v30 = vld [vmem:[%s1857_s11 + $0x38] sm:$0xff]  ;;  %v412_v32 = vsel %vm381_vm1, %v1904_v21, 0.0  ;;  %v1929_v36 = vld [vmem:[%s1857_s11 + $0x40] sm:$0xff] }
  0x1e   : > { %v1924_v33 = vld [vmem:[%s1857_s11 + $0x78] sm:$0xff]  ;;  %v393_v34 = vsel %vm381_vm1, %v1909_v24, 0.0  ;;  %v414_v38 = vsel %vm381_vm1, %v1914_v27, 0.0  ;;  %v1934_v39 = vld [vmem:[%s1857_s11 + $0x80] sm:$0xff]  ;;  %v395_v40 = vsel %vm381_vm1, %v1919_v30, 0.0  ;;  %v1941_v44 = vld [vmem:[%s1857_s11 + $0x88] sm:$0xff] }
  0x1f   : > { %v388_v25 = vadd.f32 %v387_v14, %v386_v17  ;;  %v409_v29 = vadd.f32 %v408_v20, %v407_v23  ;;  %v416_v43 = vsel %vm381_vm1, %v1924_v33, 0.0  ;;  %v397_v45 = vsel %vm381_vm1, %v1929_v36, 0.0  ;;  %v515_v14 = vld [vmem:[%s2234_s3] sm:$0x3]  ;;  %s1731_s11 = smov 24  }
  0x20   : > { %v418_v48 = vsel %vm381_vm1, %v1934_v39, 0.0  ;;  %v420_v51 = vsel %vm381_vm1, %v1941_v44, 0.0  ;;  %v1339_v17 = vld [vmem:[%s2233_s2] ss:$0 sm:$0xff] }
  0x21   : > { %v390_v31 = vadd.f32 %v389_v22, %v388_v25  ;;  %v411_v35 = vadd.f32 %v410_v26, %v409_v29  ;;  %v1341_v23 = vld [vmem:[%s2235_s4] ss:$0 sm:$0xff] }
  0x23   : > { %v392_v37 = vadd.f32 %v391_v28, %v390_v31  ;;  %v413_v41 = vadd.f32 %v412_v32, %v411_v35 }
  0x25   : > { %v394_v42 = vadd.f32 %v393_v34, %v392_v37  ;;  %v415_v46 = vadd.f32 %v414_v38, %v413_v41 }
  0x27   : > { %v396_v47 = vadd.f32 %v395_v40, %v394_v42  ;;  %v417_v49 = vadd.f32 %v416_v43, %v415_v46  ;;  %v699_v42 = vld [vmem:[%s2236_s5] sm:$0xff]  ;;  %v700_v43 = vld [vmem:[%s2236_s5 + $0x8] sm:$0xff]  ;;  %v701_v46 = vld [vmem:[%s2236_s5 + $0x10] sm:$0xff] }
  0x29   : > { %v398_v50 = vadd.f32 %v397_v45, %v396_v47  ;;  %v419_v52 = vadd.f32 %v418_v48, %v417_v49  ;;  %v1516_v45 = vpack.c.bf16 %v700_v43, %v699_v42  ;;  %v702_v47 = vld [vmem:[%s2236_s5 + $0x18] sm:$0xff]  ;;  %v703_v49 = vld [vmem:[%s2236_s5 + $0x20] sm:$0xff] }
  0x2a   : > { %v1520_v48 = vpack.c.bf16 %v702_v47, %v701_v46 }
  0x2b   : > { %v399_v53 = vrot.slane %v398_v50, 4  ;;  %v421_v54 = vadd.f32 %v420_v51, %v419_v52  ;;  %1517 = vmatprep.subr.bf16.mxu0 %v1516_v45  ;;  %v705_v52 = vld [vmem:[%s2236_s5 + $0x30] sm:$0xff] }
  0x2c   : > { %1519 = vmatpush3.bf16.msra.mxu0 %v1516_v45 }
  0x2d   : > { %v400_v55 = vadd.f32 %v399_v53, %v398_v50  ;;  %v422_v56 = vrot.slane %v421_v54, 4  ;;  %1521 = vmatprep.subr.bf16.mxu0 %v1520_v48  ;;  %v704_v50 = vld [vmem:[%s2236_s5 + $0x28] sm:$0xff]  ;;  %v706_v53 = vld [vmem:[%s2236_s5 + $0x38] sm:$0xff] }
  0x2e   : > { %v1524_v51 = vpack.c.bf16 %v704_v50, %v703_v49 }
  0x2f   : > { %v401_v57 = vrot.slane %v400_v55, 2  ;;  %v423_v58 = vadd.f32 %v422_v56, %v421_v54  ;;  %v1528_v54 = vpack.c.bf16 %v706_v53, %v705_v52 }
  0x30   : > { %1523 = vmatpush3.bf16.msra.mxu0 %v1520_v48 }
  0x31   : > { %v402_v59 = vadd.f32 %v401_v57, %v400_v55  ;;  %v424_v60 = vrot.slane %v423_v58, 2  ;;  %1525 = vmatprep.subr.bf16.mxu0 %v1524_v51 }
  0x33   : > { %v403_v61 = vrot.slane %v402_v59, 1  ;;  %v425_v62 = vadd.f32 %v424_v60, %v423_v58  ;;  %v1738_v58 = vmov 1966171168   ;;  %v652_v60 = vlaneseq }
  0x34   : > { %1527 = vmatpush3.bf16.msra.mxu0 %v1524_v51 }
  0x35   : > { %v404_v63 = vadd.f32 %v403_v61, %v402_v59  ;;  %v426_v0 = vrot.slane %v425_v62, 1  ;;  %1529 = vmatprep.subr.bf16.mxu0 %v1528_v54  ;;  %v650_v59 = vunpack.c.l.s4 %v1738_v58 }
  0x37   : > { %v427_v6 = vadd.f32 %v426_v0, %v425_v62  ;;  %v428_v7 = vmul.f32 0.015625, %v404_v63  ;;  %v651_v0 = vunpack.c.0.s8 %v650_v59 }
  0x38   : > { %1531 = vmatpush3.bf16.msra.mxu0 %v1528_v54 }
  0x39   : > { %v429_v8 = vmul.f32 0.015625, %v427_v6  ;;  %v653_v6 = vshrl.u32 %v652_v60, 7 }
  0x3b   : > { %v441_v10 = vsel %vm440_vm2, %v429_v8, %v428_v7 }
  0x3c   : > { %1424 = vmatmul.mubr.msk.f32.vlgmr.msra.gmra.mrb[0].mxu1 %vm381_vm1, %v441_v10 }
  0x3d   : > { %1428 = vmatprep.mubr.msk.f32.mxu1 %vm1730_vm0, %v1729_v1  ;;  %1427 = vmatpush3.msk.msra.mxu1 %vm527_vm3, %v515_v14 }
 0x10f   : > { %v510_v18 = vpop.f32.mrb[0].mxu1 }
 0x110   : > { %v511_v19 = vadd.f32 %v1339_v17, %v510_v18  ;;  %v1425_v20 = vpop.f32.mrb[1].mxu1  ;;  %v654_v17 = vsub.s32 %v651_v0, %v653_v6 }
 0x112   : > { %1651 = vtanh.f32 %v511_v19 }
 0x11c   : > { %v1652_v22 = vpop.eup %1651 }
 0x11d   : > { %1429 = vmatmul.mubr.msk.f32.vlgmr.msra.gmra.mrb[2].mxu1 %vm523_vm4, %v1652_v22 }
 0x11e   : > { %1492 = vmatprep.mubr.msk.f32.mxu1 %vm1730_vm0, %v1729_v1 }
 0x1f0   : > { %v597_v25 = vpop.f32.mrb[2].mxu1 }
 0x1f1   : > { %v598_v26 = vadd.f32 %v1341_v23, %v597_v25  ;;  %v1430_v28 = vpop.f32.mrb[3].mxu1  ;;  %v673_v23 = vsub.s32 0, %v653_v6 }
 0x1f3   : > { %v602_v29 = vsel %vm601_vm5, %v598_v26, -inf }
 0x1f4   : > { %603 = vmax.xlane.f32.xlu0 %v602_v29 }
 0x281   : > { %v604_v31 = vpop.xlane.xlu0 %603 }
 0x282   : > { %v605_v32 = vsub.f32 %v598_v26, %v604_v31 }
 0x284   : > { %v606_v34 = vmul.f32 1.442695, %v605_v32 }
 0x286   : > { %1653 = vpow2.f32 %v606_v34 }
 0x290   : > { %v1654_v35 = vpop.eup %1653 }
 0x291   : > { %v608_v37 = vsel %vm601_vm5, %v1654_v35, 0.0 }
 0x292   : > { %609 = vadd.xlane.f32.xlu0 %v608_v37 }
 0x31f   : > { %v610_v38 = vpop.xlane.xlu0 %609 }
 0x320   : > { %1655 = vrcp.f32 %v610_v38 }
 0x32a   : > { %v1656_v40 = vpop.eup %1655 }
 0x32b   : > { %v612_v41 = vmul.f32 %v1656_v40, %v1654_v35 }
 0x32d   : > { %620 = vrot.lane.b32.xlu0 %v612_v41, %s1731_s11  ;;  %614 = vrot.lane.b32.xlu1 %v612_v41, %s1732_s12  ;;  %s1734_s11 = smov 32   ;;  %s353_s12 = sand.u32 1, %s1719_s14  }
 0x32e   : > { %s1336_s18 = sshll.u32 %s353_s12, 1 }
 0x32f   : > { %s355_s21 = scalar_lea.vmem [#allocation2], %s1336_s18  ;;  %s1671_s18 = scalar_lea.vmem %s1670_s30, 64 }
 0x331   : > { %617 = vrot.lane.b32.xlu1 %v612_v41, %s1733_s26  ;;  %s1736_s26 = smov 48  }
 0x335   : > { %623 = vrot.lane.b32.xlu1 %v612_v41, %s1734_s11 }
 0x339   : > { %626 = vrot.lane.b32.xlu1 %v612_v41, %s1735_s25  ;;  %s1273_s25 = sshll.u32 %s355_s21, 4  ;;  %s2190_s25 = int_to_ptr.vmem [resolvable:$true] %s1273_s25 }
 0x33a   : > { %p1672_p0 = scmp.lt.s32.totalorder %s2190_s25, %s1670_s30 }
 0x33d   : > { %629 = vrot.lane.b32.xlu1 %v612_v41, %s1736_s26 }
 0x341   : > { %632 = vrot.lane.b32.xlu1 %v612_v41, %s1737_s27 }
 0x39f   : > { %v615_v55 = vpop.permute.xlu1 %614  ;;  %v621_v7 = vpop.permute.xlu0 %620 }
 0x3a0   : > { %v635_v62 = vsel %vm381_vm1, %v612_v41, %v615_v55 }
 0x3a3   : > { %v618_v56 = vpop.permute.xlu1 %617 }
 0x3a4   : > { %v637_v63 = vsel %vm636_vm6, %v635_v62, %v618_v56 }
 0x3a5   : > { %v639_v10 = vsel %vm638_vm7, %v637_v63, %v621_v7 }
 0x3a7   : > { %v624_v57 = vpop.permute.xlu1 %623 }
 0x3a8   : > { %v641_v14 = vsel %vm640_vm8, %v639_v10, %v624_v57 }
 0x3ab   : > { %v627_v61 = vpop.permute.xlu1 %626 }
 0x3ac   : > { %v643_v18 = vsel %vm642_vm9, %v641_v14, %v627_v61 }
 0x3af   : > { %v630_v8 = vpop.permute.xlu1 %629 }
 0x3b0   : > { %v645_v19 = vsel %vm644_vm10, %v643_v18, %v630_v8 }
 0x3b3   : > { %v633_v20 = vpop.permute.xlu1 %632 }
 0x3b4   : > { %v647_v22 = vsel %vm646_vm11, %v645_v19, %v633_v20 }
 0x3b5   : > { %v655_v25 = vrot.slane %v647_v22, %v654_v17 }
 0x3b7   : > { %v663_v26 = vrot.slane %v655_v25, %v654_v17  ;;  %v656_v34 = vcombine.high %v655_v25, %v655_v25 }
 0x3b9   : > { %v674_v28 = vrot.slane %v663_v26, %v673_v23 }
 0x3bb   : > { %v681_v29 = vmul.f32 %v674_v28, %v1860_v2  ;;  %v682_v31 = vmul.f32 %v674_v28, %v1863_v3  ;;  %v683_v32 = vmul.f32 %v674_v28, %v1866_v4  ;;  %v684_v35 = vmul.f32 %v674_v28, %v1869_v5 }
 0x3bc   : > { %v685_v37 = vmul.f32 %v674_v28, %v1878_v9  ;;  %v670_v2 = vrot.slane %v656_v34, %v654_v17  ;;  %v686_v3 = vmul.f32 %v674_v28, %v1892_v15  ;;  %v687_v38 = vmul.f32 %v674_v28, %v1909_v24 }
 0x3bd   : > { %1447 = vmatprep.mubr.msk.f32.mxu0 %vm714_vm12, %v681_v29  ;;  %v688_v40 = vmul.f32 %v674_v28, %v1919_v30  ;;  %v689_v5 = vmul.f32 %v674_v28, %v1929_v36 }
 0x3be   : > { %1448 = vmatmul.mubr.msk.f32.vlgmr.msra.gmra.mrb[0].mxu0 %vm714_vm12, %v682_v31  ;;  %v678_v4 = vrot.slane %v670_v2, %v673_v23  ;;  %v942_v23 = vld [vmem:[%s2238_s7] sm:$0x7f] }
 0x3bf   : > { %1450 = vmatprep.mubr.msk.f32.mxu0 %vm714_vm12, %v683_v32 }
 0x3c0   : > { %v690_v9 = vmul.f32 %v678_v4, %v1881_v11  ;;  %v691_v41 = vmul.f32 %v678_v4, %v1884_v12  ;;  %v692_v15 = vmul.f32 %v678_v4, %v1887_v13  ;;  %v693_v24 = vmul.f32 %v678_v4, %v1895_v16 }
 0x3c1   : > { %v694_v30 = vmul.f32 %v678_v4, %v1904_v21  ;;  %v695_v36 = vmul.f32 %v678_v4, %v1914_v27  ;;  %v696_v11 = vmul.f32 %v678_v4, %v1924_v33  ;;  %v697_v12 = vmul.f32 %v678_v4, %v1934_v39  ;;  %v2032_v21 = vld [vmem:[%s2237_s6] ss:$0 sm:$0xff] }
 0x3c2   : > { %1451 = vmatmul.mubr.msk.f32.gmra.mrb[2].mxu0 %vm714_vm12, %v684_v35  ;;  %v698_v13 = vmul.f32 %v678_v4, %v1941_v44  ;;  %v1739_v16 = vmov 0.0|0.0  }
 0x3c3   : > { %1453 = vmatprep.mubr.msk.f32.mxu0 %vm714_vm12, %v685_v37  ;;  %1532 = vmatprep.subr.bf16.mxu1 %v1739_v16 }
 0x3c4   : > { %1556 = vmatprep.subr.bf16.mxu0 %v1739_v16 }
 0x3c6   : > { %1454 = vmatmul.mubr.msk.f32.gmra.mrb[4].mxu0 %vm714_vm12, %v686_v3 }
 0x3c7   : > { %1456 = vmatprep.mubr.msk.f32.mxu0 %vm714_vm12, %v687_v38 }
 0x3ca   : > { %1457 = vmatmul.mubr.msk.f32.gmra.mrb[6].mxu0 %vm714_vm12, %v688_v40 }
 0x3cb   : > { %1459 = vmatprep.mubr.msk.f32.mxu0 %vm714_vm12, %v689_v5 }
 0x3ce   : > { %1460 = vmatmul.mubr.msk.f32.gmra.mrb[8].mxu0 %vm714_vm12, %v690_v9 }
 0x3cf   : > { %1462 = vmatprep.mubr.msk.f32.mxu0 %vm714_vm12, %v691_v41 }
 0x3d2   : > { %1463 = vmatmul.mubr.msk.f32.gmra.mrb[10].mxu0 %vm714_vm12, %v692_v15 }
 0x3d3   : > { %1465 = vmatprep.mubr.msk.f32.mxu0 %vm714_vm12, %v693_v24 }
 0x3d6   : > { %1466 = vmatmul.mubr.msk.f32.gmra.mrb[12].mxu0 %vm714_vm12, %v694_v30 }
 0x3d7   : > { %1468 = vmatprep.mubr.msk.f32.mxu0 %vm714_vm12, %v695_v36 }
 0x3da   : > { %1469 = vmatmul.mubr.msk.f32.gmra.mrb[14].mxu0 %vm714_vm12, %v696_v11 }
 0x3db   : > { %1471 = vmatprep.mubr.msk.f32.mxu0 %vm714_vm12, %v697_v12 }
 0x3de   : > { %1472 = vmatmul.mubr.msk.f32.gmra.mrb[16].mxu0 %vm714_vm12, %v698_v13 }
 0x491   : > { %v1449_v27 = vpop.f32.mrb[0].mxu0 }
 0x492   : > { %v841_v33 = vadd.f32 %v1449_v27, %v2032_v21  ;;  %v835_v39 = vpop.f32.mrb[1].mxu0 }
 0x493   : > { %v836_v42 = vadd.f32 %v2032_v21, %v835_v39  ;;  %v1137_v39 = vld [vmem:[%s2239_s8] sm:$0xff] }
 0x494   : > { %v925_v43 = vmul.f32 %v841_v33, %v841_v33 }
 0x495   : > { %v924_v44 = vmul.f32 %v836_v42, %v836_v42  ;;  %v1452_v45 = vpop.f32.mrb[2].mxu0  ;;  %v1138_v42 = vld [vmem:[%s2239_s8 + $0x8] sm:$0xff] }
 0x496   : > { %v851_v46 = vadd.f32 %v1452_v45, %v2032_v21  ;;  %v845_v47 = vpop.f32.mrb[3].mxu0  ;;  %v1141_v45 = vld [vmem:[%s2239_s8 + $0x20] sm:$0xff] }
 0x497   : > { %v1533_v48 = vpack.c.bf16 %v925_v43, %v924_v44  ;;  %v846_v49 = vadd.f32 %v2032_v21, %v845_v47  ;;  %v1557_v43 = vpack.c.bf16 %v1138_v42, %v1137_v39 }
 0x498   : > { %v927_v50 = vmul.f32 %v851_v46, %v851_v46  ;;  %v1142_v46 = vld [vmem:[%s2239_s8 + $0x28] sm:$0xff] }
 0x499   : > { %v926_v51 = vmul.f32 %v846_v49, %v846_v49  ;;  %v1455_v52 = vpop.f32.mrb[4].mxu0  ;;  %1534 = vmatpush3.bf16.msra.mxu1 %v1533_v48  ;;  %1558 = vmatpush1.bf16.msra.mxu0 %v1557_v43  ;;  %v1563_v47 = vpack.c.bf16 %v1142_v46, %v1141_v45  ;;  %v1143_v48 = vld [vmem:[%s2239_s8 + $0x30] sm:$0xff]  ;;  %v1144_v49 = vld [vmem:[%s2239_s8 + $0x38] sm:$0xff] }
 0x49a   : > { %v861_v53 = vadd.f32 %v1455_v52, %v2032_v21  ;;  %v855_v54 = vpop.f32.mrb[5].mxu0  ;;  %1535 = vmatprep.subr.bf16.mxu1 %v1739_v16  ;;  %1559 = vmatprep.subr.bf16.mxu0 %v1739_v16  ;;  %v1146_v52 = vld [vmem:[%s2239_s8 + $0x48] sm:$0xff] }
 0x49b   : > { %v1536_v55 = vpack.c.bf16 %v927_v50, %v926_v51  ;;  %v856_v56 = vadd.f32 %v2032_v21, %v855_v54  ;;  %v1566_v50 = vpack.c.bf16 %v1144_v49, %v1143_v48  ;;  %v1145_v51 = vld [vmem:[%s2239_s8 + $0x40] sm:$0xff]  ;;  %v1147_v54 = vld [vmem:[%s2239_s8 + $0x50] sm:$0xff] }
 0x49c   : > { %v929_v57 = vmul.f32 %v861_v53, %v861_v53  ;;  %v1569_v53 = vpack.c.bf16 %v1146_v52, %v1145_v51 }
 0x49d   : > { %v928_v58 = vmul.f32 %v856_v56, %v856_v56  ;;  %v1458_v59 = vpop.f32.mrb[6].mxu0  ;;  %1537 = vmatpush3.bf16.msra.mxu1 %v1536_v55  ;;  %v1148_v55 = vld [vmem:[%s2239_s8 + $0x58] sm:$0xff] }
 0x49e   : > { %v871_v60 = vadd.f32 %v1458_v59, %v2032_v21  ;;  %v865_v61 = vpop.f32.mrb[7].mxu0  ;;  %1538 = vmatprep.subr.bf16.mxu1 %v1739_v16  ;;  %v1572_v56 = vpack.c.bf16 %v1148_v55, %v1147_v54 }
 0x49f   : > { %v1539_v62 = vpack.c.bf16 %v929_v57, %v928_v58  ;;  %v866_v63 = vadd.f32 %v2032_v21, %v865_v61  ;;  %v1149_v57 = vld [vmem:[%s2239_s8 + $0x60] sm:$0xff]  ;;  %v1150_v58 = vld [vmem:[%s2239_s8 + $0x68] sm:$0xff]  ;;  %v1152_v61 = vld [vmem:[%s2239_s8 + $0x78] sm:$0xff] }
 0x4a0   : > { %v931_v0 = vmul.f32 %v871_v60, %v871_v60  ;;  %v1575_v59 = vpack.c.bf16 %v1150_v58, %v1149_v57  ;;  %v1151_v60 = vld [vmem:[%s2239_s8 + $0x70] sm:$0xff] }
 0x4a1   : > { %v930_v6 = vmul.f32 %v866_v63, %v866_v63  ;;  %v1461_v7 = vpop.f32.mrb[8].mxu0  ;;  %1540 = vmatpush3.bf16.msra.mxu1 %v1539_v62  ;;  %v1578_v62 = vpack.c.bf16 %v1152_v61, %v1151_v60  ;;  %v1153_v63 = vld [vmem:[%s2239_s8 + $0x80] sm:$0xff] }
 0x4a2   : > { %v875_v8 = vpop.f32.mrb[9].mxu0  ;;  %1541 = vmatprep.subr.bf16.mxu1 %v1739_v16  ;;  %v881_v17 = vadd.f32 %v1461_v7, %v2032_v21  ;;  %v1155_v7 = vld [vmem:[%s2239_s8 + $0x90] sm:$0xff] }
 0x4a3   : > { %v1542_v10 = vpack.c.bf16 %v931_v0, %v930_v6  ;;  %v876_v14 = vadd.f32 %v2032_v21, %v875_v8  ;;  %v1154_v0 = vld [vmem:[%s2239_s8 + $0x88] sm:$0xff]  ;;  %v1156_v8 = vld [vmem:[%s2239_s8 + $0x98] sm:$0xff] }
 0x4a4   : > { %v933_v25 = vmul.f32 %v881_v17, %v881_v17  ;;  %v1581_v6 = vpack.c.bf16 %v1154_v0, %v1153_v63  ;;  %v1158_v17 = vld [vmem:[%s2239_s8 + $0xa8] sm:$0xff] }
 0x4a5   : > { %v1464_v18 = vpop.f32.mrb[10].mxu0  ;;  %1543 = vmatpush3.bf16.msra.mxu1 %v1542_v10  ;;  %v932_v20 = vmul.f32 %v876_v14, %v876_v14  ;;  %v1584_v10 = vpack.c.bf16 %v1156_v8, %v1155_v7  ;;  %v1157_v14 = vld [vmem:[%s2239_s8 + $0xa0] sm:$0xff] }
 0x4a6   : > { %v885_v19 = vpop.f32.mrb[11].mxu0  ;;  %1490 = vmatprep.subr.mxu1 %v1729_v1  ;;  %v891_v26 = vadd.f32 %v1464_v18, %v2032_v21  ;;  %v1587_v18 = vpack.c.bf16 %v1158_v17, %v1157_v14 }
 0x4a7   : > { %v886_v22 = vadd.f32 %v2032_v21, %v885_v19  ;;  %v1159_v19 = vld [vmem:[%s2239_s8 + $0xb0] sm:$0xff] }
 0x4a8   : > { %v935_v35 = vmul.f32 %v891_v26, %v891_v26 }
 0x4a9   : > { %v934_v28 = vmul.f32 %v886_v22, %v886_v22  ;;  %v1467_v29 = vpop.f32.mrb[12].mxu0  ;;  %1491 = vmatpush3.msra.mxu1 %v932_v20  ;;  %v1160_v20 = vld [vmem:[%s2239_s8 + $0xb8] sm:$0xff] }
 0x4aa   : > { %v895_v31 = vpop.f32.mrb[13].mxu0  ;;  %1493 = vmatmul.mubr.msk.f32.vlgmr.msra.gmra.mrb[4].mxu1 %vm943_vm13, %v942_v23  ;;  %1544 = vmatprep.subr.bf16.mxu1 %v1739_v16  ;;  %v901_v37 = vadd.f32 %v1467_v29, %v2032_v21  ;;  %v1590_v22 = vpack.c.bf16 %v1160_v20, %v1159_v19 }
 0x4ab   : > { %v1545_v32 = vpack.c.bf16 %v934_v28, %v933_v25  ;;  %v896_v34 = vadd.f32 %v2032_v21, %v895_v31  ;;  %1513 = vmatprep.mubr.msk.f32.mxu1 %vm1730_vm0, %v1729_v1 }
 0x4ac   : > { %v937_v5 = vmul.f32 %v901_v37, %v901_v37 }
 0x4ad   : > { %v936_v2 = vmul.f32 %v896_v34, %v896_v34  ;;  %v1470_v3 = vpop.f32.mrb[14].mxu0  ;;  %1546 = vmatpush3.bf16.msra.mxu1 %v1545_v32  ;;  %v1161_v32 = vld [vmem:[%s2239_s8 + $0xc0] sm:$0xff]  ;;  %v1162_v34 = vld [vmem:[%s2239_s8 + $0xc8] sm:$0xff] }
 0x4ae   : > { %v905_v38 = vpop.f32.mrb[15].mxu0  ;;  %1547 = vmatprep.subr.bf16.mxu1 %v1739_v16  ;;  %v911_v9 = vadd.f32 %v1470_v3, %v2032_v21  ;;  %v1593_v37 = vpack.c.bf16 %v1162_v34, %v1161_v32  ;;  %v1163_v3 = vld [vmem:[%s2239_s8 + $0xd0] sm:$0xff] }
 0x4af   : > { %v1548_v4 = vpack.c.bf16 %v936_v2, %v935_v35  ;;  %v906_v40 = vadd.f32 %v2032_v21, %v905_v38  ;;  %v1164_v38 = vld [vmem:[%s2239_s8 + $0xd8] sm:$0xff] }
 0x4b0   : > { %v939_v11 = vmul.f32 %v911_v9, %v911_v9 }
 0x4b1   : > { %v938_v41 = vmul.f32 %v906_v40, %v906_v40  ;;  %v1473_v15 = vpop.f32.mrb[16].mxu0  ;;  %1549 = vmatpush3.bf16.msra.mxu1 %v1548_v4  ;;  %v1596_v4 = vpack.c.bf16 %v1164_v38, %v1163_v3 }
 0x4b2   : > { %v915_v24 = vpop.f32.mrb[17].mxu0  ;;  %1550 = vmatprep.subr.bf16.mxu1 %v1739_v16  ;;  %v921_v13 = vadd.f32 %v1473_v15, %v2032_v21 }
 0x4b3   : > { %v1551_v30 = vpack.c.bf16 %v938_v41, %v937_v5  ;;  %v916_v36 = vadd.f32 %v2032_v21, %v915_v24  ;;  %v1139_v21 = vld [vmem:[%s2239_s8 + $0x10] sm:$0xff] }
 0x4b4   : > { %v941_v33 = vmul.f32 %v921_v13, %v921_v13 }
 0x4b5   : > { %v940_v12 = vmul.f32 %v916_v36, %v916_v36  ;;  %1552 = vmatpush3.bf16.msra.mxu1 %v1551_v30 }
 0x4b6   : > { %1553 = vmatprep.subr.bf16.mxu1 %v1739_v16 }
 0x4b7   : > { %v1554_v27 = vpack.c.bf16 %v940_v12, %v939_v11 }
 0x4b9   : > { %1555 = vmatpush3.bf16.msra.mxu1 %v1554_v27 }
 0x4ba   : > { %1511 = vmatprep.subr.mxu1 %v1729_v1  ;;  %v1140_v1 = vld [vmem:[%s2239_s8 + $0x18] sm:$0xff] }
 0x4bb   : > { %v1560_v44 = vpack.c.bf16 %v1140_v1, %v1139_v21 }
 0x4bd   : > { %1512 = vmatpush3.msra.mxu1 %v941_v33  ;;  %1561 = vmatpush1.bf16.msra.mxu0 %v1560_v44 }
 0x4be   : > { %1514 = vmatmul.mubr.msk.f32.vlgmr.msra.gmra.mrb[6].mxu1 %vm943_vm13, %v942_v23  ;;  %1562 = vmatprep.subr.bf16.mxu0 %v1739_v16 }
 0x4c1   : > { %1564 = vmatpush1.bf16.msra.mxu0 %v1563_v47 }
 0x4c2   : > { %1565 = vmatprep.subr.bf16.mxu0 %v1739_v16 }
 0x4c5   : > { %1567 = vmatpush1.bf16.msra.mxu0 %v1566_v50 }
 0x4c6   : > { %1568 = vmatprep.subr.bf16.mxu0 %v1739_v16 }
 0x4c9   : > { %1570 = vmatpush1.bf16.msra.mxu0 %v1569_v53 }
 0x4ca   : > { %1571 = vmatprep.subr.bf16.mxu0 %v1739_v16 }
 0x4cd   : > { %1573 = vmatpush1.bf16.msra.mxu0 %v1572_v56  ;;  %v1365_v56 = vld [vmem:[%s2240_s9] ss:$0 sm:$0xff] }
 0x4ce   : > { %1574 = vmatprep.subr.bf16.mxu0 %v1739_v16 }
 0x4d1   : > { %1576 = vmatpush1.bf16.msra.mxu0 %v1575_v59 }
 0x4d2   : > { %1577 = vmatprep.subr.bf16.mxu0 %v1739_v16 }
 0x4d5   : > { %1579 = vmatpush1.bf16.msra.mxu0 %v1578_v62 }
 0x4d6   : > { %1580 = vmatprep.subr.bf16.mxu0 %v1739_v16 }
 0x4d9   : > { %1582 = vmatpush1.bf16.msra.mxu0 %v1581_v6 }
 0x4da   : > { %1583 = vmatprep.subr.bf16.mxu0 %v1739_v16 }
 0x4dd   : > { %1585 = vmatpush1.bf16.msra.mxu0 %v1584_v10 }
 0x4de   : > { %1586 = vmatprep.subr.bf16.mxu0 %v1739_v16 }
 0x4e1   : > { %1588 = vmatpush1.bf16.msra.mxu0 %v1587_v18 }
 0x4e2   : > { %1589 = vmatprep.subr.bf16.mxu0 %v1739_v16 }
 0x4e5   : > { %1591 = vmatpush1.bf16.msra.mxu0 %v1590_v22 }
 0x4e6   : > { %1592 = vmatprep.subr.bf16.mxu0 %v1739_v16 }
 0x4e9   : > { %1594 = vmatpush1.bf16.msra.mxu0 %v1593_v37 }
 0x4ea   : > { %1595 = vmatprep.subr.bf16.mxu0 %v1739_v16 }
 0x4ed   : > { %1597 = vmatpush1.bf16.msra.mxu0 %v1596_v4 }
 0x57d   : > { %v1013_v23 = vpop.f32.mrb[4].mxu1 }
 0x57e   : > { %v1494_v25 = vpop.f32.mrb[5].mxu1  ;;  %v1087_v26 = vmax.f32 %v1013_v23, 1e-06 }
 0x580   : > { %1657 = vlog2.f32 %v1087_v26 }
 0x58a   : > { %v1658_v35 = vpop.eup %1657 }
 0x58b   : > { %v1090_v2 = vmul.f32 0.6931472, %v1658_v35 }
 0x58d   : > { %v1098_v9 = vrot.slane %v1090_v2, 1  ;;  %v1103_v41 = vrot.slane %v1090_v2, 2  ;;  %v1119_v15 = vrot.slane %v1090_v2, 5  ;;  %v1109_v24 = vrot.slane %v1090_v2, 3 }
 0x58e   : > { %v1125_v30 = vrot.slane %v1090_v2, 6  ;;  %v1115_v33 = vrot.slane %v1090_v2, 4 }
 0x591   : > { %v1083_v28 = vpop.f32.mrb[6].mxu1 }
 0x592   : > { %v1088_v29 = vmax.f32 %v1083_v28, 1e-06  ;;  %v1515_v31 = vpop.f32.mrb[7].mxu1 }
 0x594   : > { %1659 = vlog2.f32 %v1088_v29 }
 0x59e   : > { %v1660_v40 = vpop.eup %1659 }
 0x59f   : > { %v1092_v5 = vmul.f32 0.6931472, %v1660_v40 }
 0x5a1   : > { %v1099_v36 = vsel %vm440_vm2, %v1092_v5, %v1098_v9  ;;  %v1104_v16 = vrot.slane %v1092_v5, 1  ;;  %v1120_v11 = vrot.slane %v1092_v5, 4  ;;  %v1110_v12 = vrot.slane %v1092_v5, 2 }
 0x5a2   : > { %1100 = vrot.lane.b32.xlu1 %v1099_v36, %s1734_s11  ;;  %v1126_v13 = vrot.slane %v1092_v5, 5  ;;  %v1095_v27 = vrot.slane %v1092_v5, 7  ;;  %v1116_v39 = vrot.slane %v1092_v5, 3 }
 0x5a3   : > { %v1105_v42 = vsel %vm440_vm2, %v1104_v16, %v1103_v41  ;;  %v1121_v21 = vsel %vm440_vm2, %v1120_v11, %v1119_v15  ;;  %v1111_v43 = vsel %vm440_vm2, %v1110_v12, %v1109_v24 }
 0x5a4   : > { %1106 = vrot.lane.b32.xlu0 %v1105_v42, %s1740_s28  ;;  %v1127_v1 = vsel %vm440_vm2, %v1126_v13, %v1125_v30  ;;  %v1096_v44 = vsel %vm440_vm2, %v1095_v27, %v1090_v2  ;;  %v1117_v45 = vsel %vm440_vm2, %v1116_v39, %v1115_v33 }
 0x5a6   : > { %1122 = vrot.lane.b32.xlu1 %v1121_v21, %s1734_s11  ;;  %s1665_s11 = scalar_lea.vmem %s2190_s25, 32 }
 0x5a7   : > { %p1666_p11 = scmp.ne.s32.totalorder %s2190_s25, %s1665_s11  ;;  %p1673_p1 = scmp.lt.s32.totalorder %s1671_s18, %s1665_s11 }
 0x5a8   : > { %1112 = vrot.lane.b32.xlu0 %v1111_v43, %s1741_s29  ;;  %s1260_s29 = scalar_lea.sflag [#allocation3], %s353_s12 }
 0x5a9   : > { %p1667_p12 = pnand %p1666_p11, %p1836_p5  ;;  %p1674_p2 = por %p1673_p1, %p1672_p0 }
 0x5aa   : > { %1128 = vrot.lane.b32.xlu1 %v1127_v1, %s1740_s28  ;;  %s2188_s28 = scalar_lea.hbm %s2241_s10, %s1368_s20 }
 0x5ab   : > { %p1668_p13 = pneg %p1667_p12 }
 0x5ad   : > { %p1675_p3 = pnand %p1674_p2, %p1668_p13 }
 0x614   : > { %v1101_v46 = vpop.permute.xlu1 %1100 }
 0x615   : > { %v1131_v49 = vsel %vm640_vm8, %v1096_v44, %v1101_v46 }
 0x616   : > { %v1107_v47 = vpop.permute.xlu0 %1106 }
 0x617   : > { %v1132_v53 = vsel %vm714_vm12, %v1131_v49, %v1107_v47 }
 0x618   : > { %v1123_v48 = vpop.permute.xlu1 %1122 }
 0x619   : > { %v1135_v51 = vsel %vm640_vm8, %v1117_v45, %v1123_v48 }
 0x61a   : > { %v1113_v50 = vpop.permute.xlu0 %1112 }
 0x61b   : > { %v1134_v55 = vsel %vm1133_vm14, %v1132_v53, %v1113_v50 }
 0x61c   : > { %v1129_v52 = vpop.permute.xlu1 %1128 }
 0x61d   : > { %v1136_v54 = vsel %vm714_vm12, %v1135_v51, %v1129_v52 }
 0x61e   : > { %1366 = vmatprep.mubr.msk.f32.mxu0 %vm1133_vm14, %v1136_v54 }
 0x61f   : > { %1240 = vmatmul.mubr.f32.vlgmr.msra.gmra.mrb[18].mxu0 %v1134_v55 }
 0x6f2   : > { %v1241_v57 = vpop.f32.mrb[18].mxu0 }
 0x6f3   : > { %v1242_v58 = vadd.f32 %v1365_v56, %v1241_v57  ;;  %v1243_v59 = vpop.f32.mrb[19].mxu0 }
 0x6f5   : > { %v1246_v60 = vsel %vm1245_vm15, %v1242_v58, -inf }
 0x6f6   : > { %1247 = vmax.xlane.f32.xlu1 %v1246_v60 }
 0x783   : > { %v1248_v61 = vpop.xlane.xlu1 %1247 }
 0x784   : > { %v1249_v62 = vsub.f32 %v1242_v58, %v1248_v61 }
 0x786   : > { %v1250_v63 = vmul.f32 1.442695, %v1249_v62 }
 0x788   : > { %1661 = vpow2.f32 %v1250_v63 }
 0x792   : > { %v1662_v0 = vpop.eup %1661 }
 0x793   : > { %v1252_v6 = vsel %vm1245_vm15, %v1662_v0, 0.0 }
 0x794   : > { %1253 = vadd.xlane.f32.xlu0 %v1252_v6 }
 0x821   : > { %v1254_v7 = vpop.xlane.xlu0 %1253 }
 0x822   : > { %1663 = vlog2.f32 %v1254_v7 }
 0x82c   : > { %v1664_v8 = vpop.eup %1663 }
 0x82d   : > { %v1256_v10 = vmul.f32 0.6931472, %v1664_v8 }
 0x82f   : > { %v1257_v14 = vsub.f32 %v1249_v62, %v1256_v10 }
 0x831   : > { %1258 = vst.msk [vmem:[%s355_s21] sm:$0x3] %vm1245_vm15, %v1257_v14 }
 0x832   : > { %1678 = shalt.err (!%p1675_p3)
}
 0x833   : > { %s1679_s12 = scalar_lea.hbm %s2188_s28, 32  ;;  %s1683_s26 = scalar_lea.hbm %s2241_s10, 64 }
 0x834   : > { %p1680_p4 = scmp.ne.s32.totalorder %s2188_s28, %s1679_s12  ;;  %p1684_p9 = scmp.lt.u32.totalorder %s2188_s28, %s2241_s10 }
 0x835   : > { %p1685_p10 = scmp.lt.u32.totalorder %s1683_s26, %s1679_s12  ;;  %p1687_p12 = scmp.lt.u32.totalorder %s1679_s12, %s2188_s28 }
 0x836   : > { %p1681_p7 = pnand %p1680_p4, %p1836_p5 }
 0x837   : > { %p1686_p11 = por %p1685_p10, %p1684_p9 }
 0x838   : > { %p1682_p8 = pneg %p1681_p7 }
 0x839   : > { %p1688_p13 = por %p1687_p12, %p1686_p11 }
 0x83b   : > { %p1689_p0 = pnand %p1688_p13, %p1682_p8 }
 0x83d   : > { %1692 = shalt.err (!%p1689_p0)
}
 0x83e   : > { %1599 = dma.vmem_to_hbm [thread:$0]  (%p1836_p5), %s2190_s25, 32, %s2188_s28, %s1260_s29  }
 0x83f PF: > { %p1605_p1 = scmp.ge.s32.totalorder %s1727_s16, 2  ;;  %s1285_s11 = sand.u32 1, %s1715_s13  }
 0x840   : > { %s1286_s30 = scalar_lea.sflag [#allocation3], %s1285_s11 }
 0x841   : > { %p1602_p2 = pnand %p1605_p1, %p1840_p6 }
 0x843   : > { %1710 = dma.done.wait (!%p1602_p2), %s1286_s30, 32  }
 0x844   : > { %1712 = vsyncadd (!%p1602_p2), %s1286_s30, 4294967264  ;;  %p20_p3 = scmp.ge.s32.totalorder %s1823_s19, 4   ;;  %s2244_s13 = smov %s1719_s14 }
 0x845   : > { %s2245_s14 = smov %s1723_s15  ;;  %s2246_s15 = smov %s1834_s22 }
 0x846   : > { %s2247_s16 = smov %s1823_s19  ;;  %22 = sbr.rel (!%p20_p3) target bundleno = 3 (0x3), region = 95 }
 0x84d   :  { %1291 = vsyncpa [#allocation3], 1 }
 0x84e   :  { %1293 = vsyncpa [#allocation3 + $0x1], 1 }

</bundles_post_ra>
